<compile_context>
chip_gen: v7x
topology: tpu7x:2x2x1
jax: 0.10.0
libtpu: 0.0.40
codegen_flags: <defaults>
</compile_context>

<pallas_src>
import jax
import jax.numpy as jnp
from jax.experimental import pallas as pl
from jax.experimental.pallas import tpu as pltpu

QUANT_BITS = 1
QUANT_LEVELS = float(2 ** QUANT_BITS - 1)   # 1.0 for 1-bit
INV_QUANT_LEVELS = 1.0 / QUANT_LEVELS

_LANE_WIDTH = 1024                          # wide, lane-dense last dim (multiple of 128)
_TARGET_BLOCK_BYTES = 2 << 20               # ~2 MiB per array per block


def _quantize_act_kernel(x_ref, o_ref):
    x = x_ref[...]
    y = jnp.clip(x, -1.0, 1.0)              # hardtanh
    y = (y + 1.0) * 0.5                     # [-1, 1] -> [0, 1]
    # quantize to nearest of (2^k - 1) levels; reciprocal precomputed.
    o_ref[...] = (jnp.round(y * QUANT_LEVELS) * INV_QUANT_LEVELS).astype(o_ref.dtype)


def _sublane_for_dtype(dtype):
    itemsize = jnp.dtype(dtype).itemsize
    return {4: 8, 2: 16, 1: 32}.get(itemsize, 8)


def quantize_activation(x):
    """Elementwise QuantizeActivation forward via Pallas.

    Accepts any shape / float dtype. Internally flattens + zero-pads into a
    lane-dense (rows, 1024) slab, processes it in ~2 MiB blocks, and slices
    the padding off afterwards.
    """
    orig_shape = x.shape
    dtype = x.dtype
    total = x.size
    if total == 0:
        return x

    itemsize = jnp.dtype(dtype).itemsize
    sublane = _sublane_for_dtype(dtype)
    C = _LANE_WIDTH

    # Block rows: ~2 MiB per array per block, rounded to the dtype's sublane packing.
    block_rows = max(sublane,
                     (_TARGET_BLOCK_BYTES // (C * itemsize)) // sublane * sublane)

    # Rows needed to hold the data at lane width C, rounded to sublane packing.
    rows = pl.cdiv(total, C)
    rows_min = pl.cdiv(rows, sublane) * sublane
    if rows_min <= block_rows:
        # Small tensor: a single block covering everything.
        block_rows = rows_min

    rows_padded = pl.cdiv(rows, block_rows) * block_rows
    padded_total = rows_padded * C

    x_flat = x.reshape(-1)
    if padded_total != total:
        x_flat = jnp.pad(x_flat, (0, padded_total - total))
    x2 = x_flat.reshape(rows_padded, C)

    grid = (rows_padded // block_rows,)
    blk = (block_rows, C)

    out2 = pl.pallas_call(
        _quantize_act_kernel,
        out_shape=jax.ShapeDtypeStruct((rows_padded, C), dtype),
        grid_spec=pltpu.PrefetchScalarGridSpec(
            num_scalar_prefetch=0,
            grid=grid,
            in_specs=[pl.BlockSpec(blk, lambda i: (i, 0))],
            out_specs=pl.BlockSpec(blk, lambda i: (i, 0)),
        ),
        compiler_params=pltpu.CompilerParams(
            dimension_semantics=("parallel",),
        ),
    )(x2)

    out_flat = out2.reshape(-1)
    if padded_total != total:
        out_flat = out_flat[:total]
    return out_flat.reshape(orig_shape)


def _reference(x):
    y = jnp.clip(x, -1.0, 1.0)
    y = (y + 1.0) / 2.0
    return jnp.round(y * QUANT_LEVELS) / QUANT_LEVELS


if __name__ == "__main__":
    key = jax.random.PRNGKey(0)

    # NCHW, small shapes consistent with an MNIST-style activation tensor.
    x = jax.random.normal(key, (2, 4, 16, 16), dtype=jnp.float32) * 2.0
    out = quantize_activation(x)
    out = jax.block_until_ready(out)
    ref = _reference(x)
    assert out.shape == x.shape and out.dtype == x.dtype
    assert jnp.allclose(out, ref), "mismatch vs reference (divisible case)"

    # Ragged size (not a multiple of 128) exercises the padding path.
    key2 = jax.random.PRNGKey(0)
    x2 = jax.random.normal(key2, (2, 3, 15, 15), dtype=jnp.float32) * 2.0
    out2 = quantize_activation(x2)
    out2 = jax.block_until_ready(out2)
    ref2 = _reference(x2)
    assert out2.shape == x2.shape and out2.dtype == x2.dtype
    assert jnp.allclose(out2, ref2), "mismatch vs reference (ragged case)"

    # bf16 path (exercises 16-row sublane packing).
    x3 = (jax.random.normal(jax.random.PRNGKey(1), (2, 4, 16, 16)) * 2.0).astype(jnp.bfloat16)
    out3 = jax.block_until_ready(quantize_activation(x3))
    ref3 = _reference(x3.astype(jnp.float32)).astype(jnp.bfloat16)
    assert out3.shape == x3.shape and out3.dtype == x3.dtype
    assert jnp.allclose(out3.astype(jnp.float32), ref3.astype(jnp.float32))

    print("KERNEL_OK")
</pallas_src>

<mosaic_0001>
module attributes {stable_mosaic.version = 11 : i64} {
  func.func @_quantize_act_kernel(%arg0: i32, %arg1: memref<8x1024xf32, #tpu.memory_space<vmem>>, %arg2: memref<8x1024xf32, #tpu.memory_space<vmem>>) attributes {dimension_semantics = [#tpu.dimension_semantics<parallel>], iteration_bounds = array<i64: 1>, scalar_prefetch = 0 : i64, scratch_operands = 0 : i64, tpu.core_type = #tpu.core_type<tc>, window_params = [{transform_indices = @transform_0, window_bounds = array<i64: 8, 1024>}, {transform_indices = @transform_1, window_bounds = array<i64: 8, 1024>}]} {
    %c0 = arith.constant 0 : index
    %c0_0 = arith.constant 0 : index
    %0 = vector.load %arg1[%c0, %c0_0] : memref<8x1024xf32, #tpu.memory_space<vmem>>, vector<8x1024xf32>
    %cst = arith.constant -1.000000e+00 : f32
    %cst_1 = arith.constant 1.000000e+00 : f32
    %1 = vector.broadcast %cst : f32 to vector<8x1024xf32>
    %2 = arith.maximumf %1, %0 : vector<8x1024xf32>
    %3 = vector.broadcast %cst_1 : f32 to vector<8x1024xf32>
    %4 = arith.minimumf %3, %2 : vector<8x1024xf32>
    %cst_2 = arith.constant 1.000000e+00 : f32
    %5 = vector.broadcast %cst_2 : f32 to vector<8x1024xf32>
    %6 = arith.addf %4, %5 : vector<8x1024xf32>
    %cst_3 = arith.constant 5.000000e-01 : f32
    %7 = vector.broadcast %cst_3 : f32 to vector<8x1024xf32>
    %8 = arith.mulf %6, %7 : vector<8x1024xf32>
    %cst_4 = arith.constant 1.000000e+00 : f32
    %9 = vector.broadcast %cst_4 : f32 to vector<8x1024xf32>
    %10 = arith.mulf %8, %9 : vector<8x1024xf32>
    %11 = math.roundeven %10 : vector<8x1024xf32>
    %cst_5 = arith.constant 1.000000e+00 : f32
    %12 = vector.broadcast %cst_5 : f32 to vector<8x1024xf32>
    %13 = arith.mulf %11, %12 : vector<8x1024xf32>
    %c0_6 = arith.constant 0 : index
    %c0_7 = arith.constant 0 : index
    %14 = vector.load %arg2[%c0_6, %c0_7] : memref<8x1024xf32, #tpu.memory_space<vmem>>, vector<8x1024xf32>
    tpu.vector_store %arg2[%c0_6, %c0_7], %13 {strides = array<i32>} : memref<8x1024xf32, #tpu.memory_space<vmem>>, vector<8x1024xf32>,
    return
  }
  func.func @transform_0(%arg0: i32) -> (i32, i32) {
    %c0_i32 = arith.constant 0 : i32
    %c0_i32_0 = arith.constant 0 : i32
    return %arg0, %c0_i32 : i32, i32
  }
  func.func @transform_1(%arg0: i32) -> (i32, i32) {
    %c0_i32 = arith.constant 0 : i32
    %c0_i32_0 = arith.constant 0 : i32
    return %arg0, %c0_i32 : i32, i32
  }
}

</mosaic_0001>

<bundles_post_ra>
// kernel: tpu_custom_call.1
= control target key start
LH: loop header
LB: loop body
LE: loop exit
PB: predicated region body
PF: predicated region fallthrough
CT: control target
= control target key end

     0   :  { %6 = vsyncpa [#allocation3], 0  ;;  %s194_s0 = inlined_call_operand.hbm [shape: f32[8,1024], index: 0, kind: input, shape index: {}]   ;;  %s195_s1 = inlined_call_operand.hbm [shape: f32[8,1024], index: 1, kind: output, shape index: {}]  }
   0x1   :  { %7 = vsyncpa [#allocation4], 0  ;;  %s158_s6 = smov [#allocation2]   ;;  %s110_s10 = scalar_lea.hbm %s194_s0, 1024 }
   0x2   :  { %s14_s7 = sshll.u32 %s158_s6, 4  ;;  %p111_p0 = scmp.ne.s32.totalorder %s194_s0, %s110_s10  ;;  %s15_s7 = int_to_ptr.vmem [resolvable:$true] %s14_s7 }
   0x3   :  { %p114_p1 = scmp.lt.u32.totalorder %s110_s10, %s194_s0 }
   0x5   :  { %p116_p2 = pnand %p114_p1, %p111_p0 }
   0x7   :  { %119 = shalt.err (!%p116_p2)
}
   0x8   :  { %s120_s15 = scalar_lea.vmem %s15_s7, 1024  ;;  %p125_p4 = scmp.lt.s32.totalorder %s15_s7, %s15_s7 }
   0x9   :  { %p121_p3 = scmp.ne.s32.totalorder %s15_s7, %s120_s15  ;;  %p126_p5 = scmp.lt.s32.totalorder %s120_s15, %s120_s15 }
   0xb   :  { %p127_p6 = por %p126_p5, %p125_p4 }
   0xd   :  { %p128_p7 = pnand %p127_p6, %p121_p3 }
   0xf   :  { %131 = shalt.err (!%p128_p7)
}
  0x10   :  { %17 = dma.hbm_to_vmem [thread:$0]  %s194_s0, 1024, %s15_s7, [#allocation3]  }
  0x11   :  { %154 = dma.done.wait [#allocation3], 1024  }
  0x12   :  { %155 = vsyncadd [#allocation3], 4294966272  ;;  %v21_v0 = vld [vmem:[#allocation2] sm:$0xff]  ;;  %v22_v1 = vld [vmem:[#allocation2 + $0x8] sm:$0xff]  ;;  %s159_s0 = smov [#allocation5]  }
  0x13   :  { %v23_v2 = vld [vmem:[#allocation2 + $0x10] sm:$0xff]  ;;  %v92_v3 = vclamps-f32 %v21_v0, 1.0  ;;  %v93_v4 = vclamps-f32 %v22_v1, 1.0  ;;  %v24_v6 = vld [vmem:[#allocation2 + $0x18] sm:$0xff]  ;;  %v25_v7 = vld [vmem:[#allocation2 + $0x20] sm:$0xff]  ;;  %s83_s18 = sshll.u32 %s159_s0, 4  ;;  %s84_s18 = int_to_ptr.vmem [resolvable:$true] %s83_s18 }
  0x14   :  { %v94_v5 = vclamps-f32 %v23_v2, 1.0  ;;  %v26_v8 = vld [vmem:[#allocation2 + $0x28] sm:$0xff]  ;;  %v95_v9 = vclamps-f32 %v24_v6, 1.0  ;;  %v96_v10 = vclamps-f32 %v25_v7, 1.0  ;;  %v27_v12 = vld [vmem:[#allocation2 + $0x30] sm:$0xff]  ;;  %v28_v13 = vld [vmem:[#allocation2 + $0x38] sm:$0xff]  ;;  %p137_p9 = scmp.lt.s32.totalorder %s84_s18, %s84_s18 }
  0x15   :  { %v97_v11 = vclamps-f32 %v26_v8, 1.0  ;;  %v45_v14 = vadd.f32 1.0, %v92_v3  ;;  %v46_v15 = vadd.f32 1.0, %v93_v4  ;;  %v98_v17 = vclamps-f32 %v27_v12, 1.0  ;;  %s132_s19 = scalar_lea.vmem %s84_s18, 1024 }
  0x16   :  { %v47_v16 = vadd.f32 1.0, %v94_v5  ;;  %v48_v18 = vadd.f32 1.0, %v95_v9  ;;  %v49_v19 = vadd.f32 1.0, %v96_v10  ;;  %v99_v21 = vclamps-f32 %v28_v13, 1.0  ;;  %p133_p8 = scmp.ne.s32.totalorder %s84_s18, %s132_s19  ;;  %p138_p10 = scmp.lt.s32.totalorder %s132_s19, %s132_s19 }
  0x17   :  { %v50_v20 = vadd.f32 1.0, %v97_v11  ;;  %v53_v22 = vmul.f32 0.5, %v45_v14  ;;  %v54_v23 = vmul.f32 0.5, %v46_v15  ;;  %v51_v25 = vadd.f32 1.0, %v98_v17 }
  0x18   :  { %v55_v24 = vmul.f32 0.5, %v47_v16  ;;  %v56_v26 = vmul.f32 0.5, %v48_v18  ;;  %v57_v27 = vmul.f32 0.5, %v49_v19  ;;  %v52_v29 = vadd.f32 1.0, %v99_v21  ;;  %p139_p11 = por %p138_p10, %p137_p9 }
  0x19   :  { %v58_v28 = vmul.f32 0.5, %v50_v20  ;;  %v100_v30 = vround.rtne.f32 %v53_v22  ;;  %v101_v31 = vround.rtne.f32 %v54_v23  ;;  %v59_v33 = vmul.f32 0.5, %v51_v25 }
  0x1a   :  { %v102_v32 = vround.rtne.f32 %v55_v24  ;;  %v103_v34 = vround.rtne.f32 %v56_v26  ;;  %v104_v35 = vround.rtne.f32 %v57_v27  ;;  %v60_v37 = vmul.f32 0.5, %v52_v29  ;;  %p140_p12 = pnand %p139_p11, %p133_p8 }
  0x1b   :  { %v105_v36 = vround.rtne.f32 %v58_v28  ;;  %69 = vst [vmem:[#allocation5] sm:$0xff] %v100_v30  ;;  %70 = vst [vmem:[#allocation5 + $0x8] sm:$0xff] %v101_v31  ;;  %v106_v38 = vround.rtne.f32 %v59_v33 }
  0x1c   :  { %71 = vst [vmem:[#allocation5 + $0x10] sm:$0xff] %v102_v32  ;;  %72 = vst [vmem:[#allocation5 + $0x18] sm:$0xff] %v103_v34  ;;  %v107_v39 = vround.rtne.f32 %v60_v37 }
  0x1d   :  { %73 = vst [vmem:[#allocation5 + $0x20] sm:$0xff] %v104_v35  ;;  %74 = vst [vmem:[#allocation5 + $0x28] sm:$0xff] %v105_v36 }
  0x1e   :  { %75 = vst [vmem:[#allocation5 + $0x30] sm:$0xff] %v106_v38  ;;  %76 = vst [vmem:[#allocation5 + $0x38] sm:$0xff] %v107_v39 }
  0x1f   :  { %143 = shalt.err (!%p140_p12)
}
  0x20   :  { %s144_s22 = scalar_lea.hbm %s195_s1, 1024 }
  0x21   :  { %p145_p13 = scmp.ne.s32.totalorder %s195_s1, %s144_s22  ;;  %p148_p0 = scmp.lt.u32.totalorder %s144_s22, %s195_s1 }
  0x23   :  { %p150_p1 = pnand %p148_p0, %p145_p13 }
  0x25   :  { %153 = shalt.err (!%p150_p1)
}
  0x26   :  { %86 = dma.vmem_to_hbm [thread:$0]  %s84_s18, 1024, %s195_s1, [#allocation4]  }
  0x27   :  { %156 = dma.done.wait [#allocation4], 1024  }
  0x28   :  { %157 = vsyncadd [#allocation4], 4294966272 }
  0x29   :  { %90 = vsyncpa [#allocation3], 1 }
  0x2a   :  { %91 = vsyncpa [#allocation4], 1 }

</bundles_post_ra>
